<compile_context>
chip_gen: v7x
topology: tpu7x:2x2x1
jax: 0.10.0
libtpu: 0.0.40
codegen_flags: <defaults>
</compile_context>

<pallas_src>
import functools

import jax
import jax.numpy as jnp
from jax import lax
from jax.experimental import pallas as pl
from jax.experimental.pallas import tpu as pltpu

LANE = 128


def _round_up(v, m):
    return -(-v // m) * m


def _vmem_capacity_bytes():
    """Per-core VMEM capacity, with a conservative (v7x) fallback."""
    try:
        cap = getattr(pltpu.get_tpu_info(), "vmem_capacity_bytes", None)
        if cap:
            return int(cap)
    except Exception:
        pass
    return 64 * 1024 * 1024


def _vmem_model(n_pad, b, i, d, op, cd_bytes):
    """(resident_bytes, bytes_per_tile_row) rough VMEM model."""
    di = d * i
    resident = (n_pad * d * 4                 # E               (f32)
                + n_pad * b * i * cd_bytes    # x2              (compute dtype)
                + n_pad * di * 4              # e_exp           (f32)
                + di * op * cd_bytes          # packed weights  (compute dtype)
                + d * op * 4)                 # packed bias     (f32)
    per_row = (n_pad * (4 + cd_bytes)         # logits/supports (+ bf16 copy)
               + b * i * 4 * 2                # x_g + identity slice
               + b * di * (4 + cd_bytes)      # tiled x_g + z
               + b * op * 4 * 3)              # projection + 2x out block
    return resident, per_row


def _choose_tile_n(n, b, i, d, op, cd_bytes, budget_bytes):
    """VMEM-budget-aware node-tile size (B/O aware)."""
    n8 = _round_up(n, 8)
    resident, per_row = _vmem_model(n8, b, i, d, op, cd_bytes)
    avail = budget_bytes - resident
    if avail <= 0:
        # TODO(synk): residents alone exceed the VMEM budget (huge N*B*I); the
        # aggregation's contraction dim would need tiling too.
        return min(n, 8)
    t = avail // max(per_row, 1)
    if t >= n:
        if n >= 256:                      # keep >=2 grid steps -> megacore/v7x
            return _round_up(-(-n // 2), 8)
        return n                          # single tile covers every node
    t = max(8, (t // 8) * 8)
    return min(t, 256)                    # ~256 rows amortize per-step overhead


def embgcn_nogate_kernel(emb_ref, x2_ref, e_exp_ref, wp_ref, bp_ref, out_ref,
                         *, batch, dim_in, tile_n, n_real):
    n_pad, d = emb_ref.shape
    b, i, tn = batch, dim_in, tile_n
    di = d * i

    row0 = pl.multiple_of(pl.program_id(0) * tn, tn)
    emb_t = emb_ref[pl.ds(row0, tn), :]                       # [Tn, D] f32

    # --- supports tile: softmax(relu(E_t @ E^T), axis=1) -> [Tn, N_pad] ---
    logits = lax.dot_general(emb_t, emb_ref[...], (((1,), (1,)), ((), ())),
                             preferred_element_type=jnp.float32)
    logits = jnp.maximum(logits, 0.0)
    if n_pad != n_real:   # static branch: mask zero-padded node columns
        cols = lax.broadcasted_iota(jnp.int32, logits.shape, 1)
        logits = jnp.where(cols < n_real, logits, -jnp.inf)
    m = jnp.max(logits, axis=1, keepdims=True)
    e = jnp.exp(logits - m)
    denom = jnp.sum(e, axis=1, keepdims=True)
    supports = e * pl.reciprocal(denom, approx=True)          # EUP, off the VALU

    # --- aggregation (I_N + S) x as ONE lane-dense matmul + add: [Tn, B*I] ---
    cd = x2_ref.dtype
    x_g = jnp.dot(supports.astype(cd), x2_ref[...],
                  preferred_element_type=jnp.float32)
    x_g = x_g + x2_ref[pl.ds(row0, tn), :].astype(jnp.float32)

    # --- Khatri-Rao features, lane-dense last dim D*I ---
    #   z[n*B + b', d*I + i'] = E[n, d] * x_g[n, b', i']
    e_exp_t = e_exp_ref[pl.ds(row0, tn), :]                   # [Tn, D*I] f32
    xg_t = jnp.tile(x_g.reshape(tn, b, i), (1, 1, d))         # [Tn, B, D*I]
    z = (e_exp_t[:, None, :] * xg_t).reshape(tn * b, di)

    # --- per-node projection + per-node bias (broadcast over batch) ---
    proj = jnp.dot(z.astype(wp_ref.dtype), wp_ref[...],
                   preferred_element_type=jnp.float32)        # [Tn*B, Op]
    bn = jnp.dot(emb_t, bp_ref[...],
                 preferred_element_type=jnp.float32)          # [Tn,   Op]
    out = proj.reshape(tn, b, -1) + bn[:, None, :]
    out_ref[...] = out.reshape(tn * b, -1).astype(out_ref.dtype)


def embgcn_nogate(x, node_embeddings, weights_pool, bias_pool,
                  *, compute_dtype=jnp.bfloat16):
    B, N, I = x.shape
    D, I2, O = weights_pool.shape
    assert I == I2 and node_embeddings.shape == (N, D)
    assert bias_pool.shape == (D, O)

    cd = jnp.dtype(compute_dtype)
    cd_bytes = cd.itemsize
    Op = _round_up(max(O, LANE), LANE)                 # lane-dense output stores

    cap = _vmem_capacity_bytes()
    tile_n = _choose_tile_n(N, B, I, D, Op, cd_bytes, (cap * 7) // 10)
    n_pad = _round_up(N, tile_n)
    grid = (n_pad // tile_n,)

    # explicit scoped-VMEM limit from the working-set estimate
    resident, per_row = _vmem_model(n_pad, B, I, D, Op, cd_bytes)
    est = resident + tile_n * per_row
    vmem_limit = int(min((cap * 9) // 10, max(32 * 2 ** 20, (est * 3) // 2)))

    # ---- wrapper-side layout plumbing (XLA-side pad / reshape / transpose) ----
    emb = node_embeddings.astype(jnp.float32)
    x2 = jnp.transpose(x, (1, 0, 2)).reshape(N, B * I)          # [N, B*I]
    if n_pad != N:
        emb = jnp.pad(emb, ((0, n_pad - N), (0, 0)))
        x2 = jnp.pad(x2, ((0, n_pad - N), (0, 0)))
    e_exp = jnp.repeat(emb, I, axis=1)                          # [N_pad, D*I]
    wp = weights_pool.reshape(D * I, O)                         # [D*I, O]
    bp = bias_pool.astype(jnp.float32)                          # [D, O]
    if Op != O:
        wp = jnp.pad(wp, ((0, 0), (0, Op - O)))
        bp = jnp.pad(bp, ((0, 0), (0, Op - O)))
    x2 = x2.astype(cd)          # bf16 MXU operands (f32 accumulation in-kernel)
    wp = wp.astype(cd)

    kernel = functools.partial(embgcn_nogate_kernel, batch=B, dim_in=I,
                               tile_n=tile_n, n_real=N)

    # Residents are single-copy, single-buffered VMEM (constant across the
    # grid, so double-buffering them would be pure VMEM waste); only the
    # output is pipelined across node tiles.
    resident_spec = lambda: pl.BlockSpec(memory_space=pltpu.MemorySpace.VMEM)

    out2 = pl.pallas_call(
        kernel,
        out_shape=jax.ShapeDtypeStruct((n_pad * B, Op), jnp.float32),
        grid_spec=pltpu.PrefetchScalarGridSpec(
            num_scalar_prefetch=0,
            grid=grid,
            in_specs=[resident_spec(),   # E        [N_pad, D]    f32
                      resident_spec(),   # x2       [N_pad, B*I]  compute dtype
                      resident_spec(),   # e_exp    [N_pad, D*I]  f32
                      resident_spec(),   # packed W [D*I, Op]     compute dtype
                      resident_spec()],  # packed b [D, Op]       f32
            out_specs=pl.BlockSpec((tile_n * B, Op), lambda i: (i, 0)),
        ),
        compiler_params=pltpu.CompilerParams(
            dimension_semantics=("parallel",),
            vmem_limit_bytes=vmem_limit),
    )(emb, x2, e_exp, wp, bp)

    # ---- un-pad / un-transpose back to [B, N, O] ----
    return out2.reshape(n_pad, B, Op)[:N, :, :O].transpose(1, 0, 2)


def embgcn_nogate_ref(x, node_embeddings, weights_pool, bias_pool):
    """Pure-JAX reference mirroring the PyTorch forward."""
    n = node_embeddings.shape[0]
    supports = jax.nn.softmax(
        jnp.maximum(node_embeddings @ node_embeddings.T, 0.0), axis=1)
    supports = jnp.eye(n, dtype=supports.dtype) + supports
    weights = jnp.einsum('nd,dio->nio', node_embeddings, weights_pool)
    bias = node_embeddings @ bias_pool
    x_g = jnp.einsum('nm,bmc->bnc', supports, x)
    return jnp.einsum('bni,nio->bno', x_g, weights) + bias[None, :, :]


if __name__ == "__main__":
    # Small shapes consistent with the module's forward.
    B, N, dim_in, dim_out, embed_dim = 2, 8, 4, 32, 8

    key = jax.random.PRNGKey(0)
    k_x, k_e, k_w, k_b = jax.random.split(key, 4)

    x = jax.random.normal(k_x, (B, N, dim_in), dtype=jnp.float32)
    node_embeddings = jax.random.normal(k_e, (N, embed_dim), dtype=jnp.float32)
    weights_pool = 0.1 * jax.random.normal(
        k_w, (embed_dim, dim_in, dim_out), dtype=jnp.float32)
    bias_pool = 0.1 * jax.random.normal(
        k_b, (embed_dim, dim_out), dtype=jnp.float32)

    ref = embgcn_nogate_ref(x, node_embeddings, weights_pool, bias_pool)

    # 1) f32 MXU operands: tight parity with the reference (only the EUP
    #    approximate reciprocal in the softmax differs).
    out_f32 = embgcn_nogate(x, node_embeddings, weights_pool, bias_pool,
                            compute_dtype=jnp.float32)
    jax.block_until_ready(out_f32)
    assert out_f32.shape == (B, N, dim_out)
    assert jnp.allclose(out_f32, ref, atol=5e-3, rtol=5e-3), (
        float(jnp.max(jnp.abs(out_f32 - ref))))

    # 2) default fast path: bf16 MXU operands with f32 accumulation.
    out_bf16 = embgcn_nogate(x, node_embeddings, weights_pool, bias_pool)
    jax.block_until_ready(out_bf16)
    assert out_bf16.shape == (B, N, dim_out)
    assert jnp.allclose(out_bf16, ref, atol=5e-2, rtol=5e-2), (
        float(jnp.max(jnp.abs(out_bf16 - ref))))

    print("KERNEL_OK")
</pallas_src>

<mosaic_0001>
module attributes {stable_mosaic.version = 11 : i64} {
  func.func @embgcn_nogate_kernel(%arg0: i32, %arg1: memref<8x8xf32, #tpu.memory_space<vmem>>, %arg2: memref<8x8xf32, #tpu.memory_space<vmem>>, %arg3: memref<8x32xf32, #tpu.memory_space<vmem>>, %arg4: memref<32x128xf32, #tpu.memory_space<vmem>>, %arg5: memref<8x128xf32, #tpu.memory_space<vmem>>, %arg6: memref<16x128xf32, #tpu.memory_space<vmem>>) attributes {dimension_semantics = [#tpu.dimension_semantics<parallel>], iteration_bounds = array<i64: 1>, scalar_prefetch = 0 : i64, scratch_operands = 0 : i64, tpu.core_type = #tpu.core_type<tc>, window_params = [{pipeline_mode = #tpu.pipeline_mode<synchronous>, transform_indices = @transform_0, window_bounds = array<i64: 8, 8>}, {pipeline_mode = #tpu.pipeline_mode<synchronous>, transform_indices = @transform_1, window_bounds = array<i64: 8, 8>}, {pipeline_mode = #tpu.pipeline_mode<synchronous>, transform_indices = @transform_2, window_bounds = array<i64: 8, 32>}, {pipeline_mode = #tpu.pipeline_mode<synchronous>, transform_indices = @transform_3, window_bounds = array<i64: 32, 128>}, {pipeline_mode = #tpu.pipeline_mode<synchronous>, transform_indices = @transform_4, window_bounds = array<i64: 8, 128>}, {transform_indices = @transform_5, window_bounds = array<i64: 16, 128>}]} {
    %c8_i32 = arith.constant 8 : i32
    %0 = arith.muli %arg0, %c8_i32 : i32
    %1 = tpu.assume_multiple %0, 8 : i32
    %2 = arith.index_cast %1 : i32 to index
    %c0 = arith.constant 0 : index
    %3 = vector.load %arg1[%2, %c0] : memref<8x8xf32, #tpu.memory_space<vmem>>, vector<8x8xf32>
    %c0_0 = arith.constant 0 : index
    %c0_1 = arith.constant 0 : index
    %4 = vector.load %arg1[%c0_0, %c0_1] : memref<8x8xf32, #tpu.memory_space<vmem>>, vector<8x8xf32>
    %cst = arith.constant dense<0.000000e+00> : vector<8x8xf32>
    %5 = tpu.matmul %3, %4, %cst {dimension_numbers = #tpu.dot_dimension_numbers<[1], [1], [0], [0], [0, 0, 1, 0], [], []>} : vector<8x8xf32>, vector<8x8xf32>, vector<8x8xf32> -> vector<8x8xf32>
    %cst_2 = arith.constant 0.000000e+00 : f32
    %6 = vector.broadcast %cst_2 : f32 to vector<8x8xf32>
    %7 = arith.maximumf %5, %6 : vector<8x8xf32>
    %cst_3 = arith.constant dense<0xFF800000> : vector<8xf32>
    %8 = vector.multi_reduction <maximumf>, %7, %cst_3 [1] : vector<8x8xf32> to vector<8xf32>
    %9 = vector.shape_cast %8 : vector<8xf32> to vector<8x1xf32>
    %10 = vector.broadcast %9 : vector<8x1xf32> to vector<8x8xf32>
    %11 = arith.subf %7, %10 : vector<8x8xf32>
    %12 = math.exp %11 : vector<8x8xf32>
    %cst_4 = arith.constant dense<0.000000e+00> : vector<8xf32>
    %13 = vector.multi_reduction <add>, %12, %cst_4 [1] : vector<8x8xf32> to vector<8xf32>
    %14 = vector.shape_cast %13 : vector<8xf32> to vector<8x1xf32>
    %15 = tpu.reciprocal %14 {approx = true} : vector<8x1xf32> -> vector<8x1xf32>
    %16 = vector.broadcast %15 : vector<8x1xf32> to vector<8x8xf32>
    %17 = arith.mulf %12, %16 : vector<8x8xf32>
    %c0_5 = arith.constant 0 : index
    %c0_6 = arith.constant 0 : index
    %18 = vector.load %arg2[%c0_5, %c0_6] : memref<8x8xf32, #tpu.memory_space<vmem>>, vector<8x8xf32>
    %cst_7 = arith.constant dense<0.000000e+00> : vector<8x8xf32>
    %19 = tpu.matmul %17, %18, %cst_7 {dimension_numbers = #tpu.dot_dimension_numbers<[1], [0], [0], [1], [0, 0, 1, 1], [], []>} : vector<8x8xf32>, vector<8x8xf32>, vector<8x8xf32> -> vector<8x8xf32>
    %20 = arith.index_cast %1 : i32 to index
    %c0_8 = arith.constant 0 : index
    %21 = vector.load %arg2[%20, %c0_8] : memref<8x8xf32, #tpu.memory_space<vmem>>, vector<8x8xf32>
    %22 = arith.addf %19, %21 : vector<8x8xf32>
    %23 = arith.index_cast %1 : i32 to index
    %c0_9 = arith.constant 0 : index
    %24 = vector.load %arg3[%23, %c0_9] : memref<8x32xf32, #tpu.memory_space<vmem>>, vector<8x32xf32>
    %25 = vector.shape_cast %22 : vector<8x8xf32> to vector<8x2x4xf32>
    %26 = tpu.concatenate %25, %25, %25, %25, %25, %25, %25, %25 in 2 : vector<8x2x4xf32>, vector<8x2x4xf32>, vector<8x2x4xf32>, vector<8x2x4xf32>, vector<8x2x4xf32>, vector<8x2x4xf32>, vector<8x2x4xf32>, vector<8x2x4xf32> -> vector<8x2x32xf32>
    %27 = vector.shape_cast %24 : vector<8x32xf32> to vector<8x1x32xf32>
    %28 = vector.broadcast %27 : vector<8x1x32xf32> to vector<8x2x32xf32>
    %29 = arith.mulf %28, %26 : vector<8x2x32xf32>
    %30 = vector.shape_cast %29 : vector<8x2x32xf32> to vector<16x32xf32>
    %c0_10 = arith.constant 0 : index
    %c0_11 = arith.constant 0 : index
    %31 = vector.load %arg4[%c0_10, %c0_11] : memref<32x128xf32, #tpu.memory_space<vmem>>, vector<32x128xf32>
    %cst_12 = arith.constant dense<0.000000e+00> : vector<16x128xf32>
    %32 = tpu.matmul %30, %31, %cst_12 {dimension_numbers = #tpu.dot_dimension_numbers<[1], [0], [0], [1], [0, 0, 1, 1], [], []>} : vector<16x32xf32>, vector<32x128xf32>, vector<16x128xf32> -> vector<16x128xf32>
    %c0_13 = arith.constant 0 : index
    %c0_14 = arith.constant 0 : index
    %33 = vector.load %arg5[%c0_13, %c0_14] : memref<8x128xf32, #tpu.memory_space<vmem>>, vector<8x128xf32>
    %cst_15 = arith.constant dense<0.000000e+00> : vector<8x128xf32>
    %34 = tpu.matmul %3, %33, %cst_15 {dimension_numbers = #tpu.dot_dimension_numbers<[1], [0], [0], [1], [0, 0, 1, 1], [], []>} : vector<8x8xf32>, vector<8x128xf32>, vector<8x128xf32> -> vector<8x128xf32>
    %35 = vector.shape_cast %32 : vector<16x128xf32> to vector<8x2x128xf32>
    %36 = vector.shape_cast %34 : vector<8x128xf32> to vector<8x1x128xf32>
    %37 = vector.broadcast %36 : vector<8x1x128xf32> to vector<8x2x128xf32>
    %38 = arith.addf %35, %37 : vector<8x2x128xf32>
    %39 = vector.shape_cast %38 : vector<8x2x128xf32> to vector<16x128xf32>
    %c0_16 = arith.constant 0 : index
    %c0_17 = arith.constant 0 : index
    %40 = vector.load %arg6[%c0_16, %c0_17] : memref<16x128xf32, #tpu.memory_space<vmem>>, vector<16x128xf32>
    tpu.vector_store %arg6[%c0_16, %c0_17], %39 {strides = array<i32>} : memref<16x128xf32, #tpu.memory_space<vmem>>, vector<16x128xf32>,
    return
  }
  func.func @transform_0(%arg0: i32) -> (i32, i32) {
    %c0_i32 = arith.constant 0 : i32
    %c0_i32_0 = arith.constant 0 : i32
    %c0_i32_1 = arith.constant 0 : i32
    return %c0_i32, %c0_i32_0 : i32, i32
  }
  func.func @transform_1(%arg0: i32) -> (i32, i32) {
    %c0_i32 = arith.constant 0 : i32
    %c0_i32_0 = arith.constant 0 : i32
    %c0_i32_1 = arith.constant 0 : i32
    return %c0_i32, %c0_i32_0 : i32, i32
  }
  func.func @transform_2(%arg0: i32) -> (i32, i32) {
    %c0_i32 = arith.constant 0 : i32
    %c0_i32_0 = arith.constant 0 : i32
    %c0_i32_1 = arith.constant 0 : i32
    return %c0_i32, %c0_i32_0 : i32, i32
  }
  func.func @transform_3(%arg0: i32) -> (i32, i32) {
    %c0_i32 = arith.constant 0 : i32
    %c0_i32_0 = arith.constant 0 : i32
    %c0_i32_1 = arith.constant 0 : i32
    return %c0_i32, %c0_i32_0 : i32, i32
  }
  func.func @transform_4(%arg0: i32) -> (i32, i32) {
    %c0_i32 = arith.constant 0 : i32
    %c0_i32_0 = arith.constant 0 : i32
    %c0_i32_1 = arith.constant 0 : i32
    return %c0_i32, %c0_i32_0 : i32, i32
  }
  func.func @transform_5(%arg0: i32) -> (i32, i32) {
    %c0_i32 = arith.constant 0 : i32
    %c0_i32_0 = arith.constant 0 : i32
    return %arg0, %c0_i32 : i32, i32
  }
}

</mosaic_0001>

<bundles_post_ra>
// kernel: tpu_custom_call.1
= control target key start
LH: loop header
LB: loop body
LE: loop exit
PB: predicated region body
PF: predicated region fallthrough
CT: control target
= control target key end

     0   :  { %10 = vsyncpa [#allocation3], 0  ;;  %s1664_s0 = inlined_call_operand.hbm [shape: f32[8,8], index: 0, kind: input, shape index: {}]   ;;  %s1665_s1 = inlined_call_operand.hbm [shape: f32[8,8], index: 1, kind: input, shape index: {}]   ;;  %s1666_s2 = inlined_call_operand.hbm [shape: f32[8,32], index: 2, kind: input, shape index: {}]   ;;  %s1667_s3 = inlined_call_operand.hbm [shape: f32[32,128], index: 3, kind: input, shape index: {}]   ;;  %s1668_s4 = inlined_call_operand.vmem [shape: f32[8,128], index: 4, kind: input, shape index: {}]   ;;  %s1669_s5 = inlined_call_operand.hbm [shape: f32[16,128], index: 5, kind: output, shape index: {}]  }
   0x1   :  { %11 = vsyncpa [#allocation6], 0 }
   0x2   :  { %12 = vsyncpa [#allocation9], 0 }
   0x3   :  { %13 = vsyncpa [#allocation4], 0  ;;  %s1245_s18 = smov [#allocation5]   ;;  %s1246_s20 = smov [#allocation2]  }
   0x4   :  { %s30_s19 = sshll.u32 %s1245_s18, 4  ;;  %s20_s21 = sshll.u32 %s1246_s20, 4  ;;  %s31_s19 = int_to_ptr.vmem [resolvable:$true] %s30_s19  ;;  %s21_s21 = int_to_ptr.vmem [resolvable:$true] %s20_s21 }
   0x5   :  { %s1127_s24 = scalar_lea.hbm %s1665_s1, 128 }
   0x6   :  { %p1128_p0 = scmp.ne.s32.totalorder %s1665_s1, %s1127_s24  ;;  %p1131_p1 = scmp.lt.u32.totalorder %s1127_s24, %s1665_s1 }
   0x8   :  { %p1133_p2 = pnand %p1131_p1, %p1128_p0 }
   0xa   :  { %1136 = shalt.err (!%p1133_p2)
}
   0xb   :  { %s1137_s29 = scalar_lea.vmem %s31_s19, 128  ;;  %p1142_p4 = scmp.lt.s32.totalorder %s31_s19, %s31_s19 }
   0xc   :  { %p1138_p3 = scmp.ne.s32.totalorder %s31_s19, %s1137_s29  ;;  %p1143_p5 = scmp.lt.s32.totalorder %s1137_s29, %s1137_s29 }
   0xe   :  { %p1144_p6 = por %p1143_p5, %p1142_p4 }
  0x10   :  { %p1145_p7 = pnand %p1144_p6, %p1138_p3 }
  0x12   :  { %1148 = shalt.err (!%p1145_p7)
}
  0x13   :  { %33 = dma.hbm_to_vmem [thread:$0]  %s1665_s1, 128, %s31_s19, [#allocation6]  }
  0x14   :  { %s1149_s9 = scalar_lea.hbm %s1664_s0, 128 }
  0x15   :  { %p1150_p8 = scmp.ne.s32.totalorder %s1664_s0, %s1149_s9  ;;  %p1153_p9 = scmp.lt.u32.totalorder %s1149_s9, %s1664_s0 }
  0x17   :  { %p1155_p10 = pnand %p1153_p9, %p1150_p8 }
  0x19   :  { %1158 = shalt.err (!%p1155_p10)
}
  0x1a   :  { %s1159_s14 = scalar_lea.vmem %s21_s21, 128  ;;  %p1164_p12 = scmp.lt.s32.totalorder %s21_s21, %s21_s21 }
  0x1b   :  { %p1160_p11 = scmp.ne.s32.totalorder %s21_s21, %s1159_s14  ;;  %p1165_p13 = scmp.lt.s32.totalorder %s1159_s14, %s1159_s14 }
  0x1d   :  { %p1166_p0 = por %p1165_p13, %p1164_p12 }
  0x1f   :  { %p1167_p1 = pnand %p1166_p0, %p1160_p11 }
  0x21   :  { %1170 = shalt.err (!%p1167_p1)
}
  0x22   :  { %23 = dma.hbm_to_vmem [thread:$0]  %s1664_s0, 128, %s21_s21, [#allocation3]  }
  0x23   :  { %s1247_s16 = smov [#allocation7]   ;;  %s1248_s18 = smov [#allocation8]  }
  0x24   :  { %s40_s17 = sshll.u32 %s1247_s16, 4  ;;  %s49_s19 = sshll.u32 %s1248_s18, 4  ;;  %s41_s17 = int_to_ptr.vmem [resolvable:$true] %s40_s17  ;;  %s1318_s19 = int_to_ptr.vmem [resolvable:$true] %s49_s19 }
  0x25   :  { %s1171_s23 = scalar_lea.hbm %s1666_s2, 128 }
  0x26   :  { %p1172_p2 = scmp.ne.s32.totalorder %s1666_s2, %s1171_s23  ;;  %p1175_p3 = scmp.lt.u32.totalorder %s1171_s23, %s1666_s2 }
  0x28   :  { %p1177_p4 = pnand %p1175_p3, %p1172_p2 }
  0x2a   :  { %1180 = shalt.err (!%p1177_p4)
}
  0x2b   :  { %s1181_s0 = scalar_lea.vmem %s41_s17, 128  ;;  %p1186_p6 = scmp.lt.s32.totalorder %s41_s17, %s41_s17 }
  0x2c   :  { %p1182_p5 = scmp.ne.s32.totalorder %s41_s17, %s1181_s0  ;;  %p1187_p7 = scmp.lt.s32.totalorder %s1181_s0, %s1181_s0 }
  0x2e   :  { %p1188_p8 = por %p1187_p7, %p1186_p6 }
  0x30   :  { %p1189_p9 = pnand %p1188_p8, %p1182_p5 }
  0x32   :  { %1192 = shalt.err (!%p1189_p9)
}
  0x33   :  { %43 = dma.hbm_to_vmem [thread:$0]  %s1666_s2, 128, %s41_s17, [#allocation6]  }
  0x34   :  { %s1193_s6 = scalar_lea.hbm %s1667_s3, 512 }
  0x35   :  { %p1194_p10 = scmp.ne.s32.totalorder %s1667_s3, %s1193_s6  ;;  %p1197_p11 = scmp.lt.u32.totalorder %s1193_s6, %s1667_s3 }
  0x37   :  { %p1199_p12 = pnand %p1197_p11, %p1194_p10 }
  0x39   :  { %1202 = shalt.err (!%p1199_p12)
}
  0x3a   :  { %s1203_s11 = scalar_lea.vmem %s1318_s19, 512  ;;  %p1208_p0 = scmp.lt.s32.totalorder %s1318_s19, %s1318_s19 }
  0x3b   :  { %p1204_p13 = scmp.ne.s32.totalorder %s1318_s19, %s1203_s11  ;;  %p1209_p1 = scmp.lt.s32.totalorder %s1203_s11, %s1203_s11 }
  0x3d   :  { %p1210_p2 = por %p1209_p1, %p1208_p0 }
  0x3f   :  { %p1211_p3 = pnand %p1210_p2, %p1204_p13 }
  0x41   :  { %1214 = shalt.err (!%p1211_p3)
}
  0x42   :  { %s1249_s2 = smov 128   ;;  %s1250_s12 = smov 8  }
  0x43   :  { %55 = dma.hbm_to_vmem [thread:$0]  %s1667_s3, 512, %s1318_s19, [#allocation9], %s1249_s2, %s1249_s2, %s1250_s12  }
  0x44   :  { %1237 = dma.done.wait [#allocation3], 128  }
  0x45   :  { %1238 = vsyncadd [#allocation3], 4294967168 }
  0x46   :  { %1239 = dma.done.wait [#allocation6], 256  }
  0x47   :  { %1240 = vsyncadd [#allocation6], 4294967040 }
  0x48   :  { %1241 = dma.done.wait [#allocation9], 512  }
  0x49   :  { %1242 = vsyncadd [#allocation9], 4294966784  ;;  %v1251_v0 = vmov 0.0   ;;  %vm1252_vm0 = vmmov 0   ;;  %vm74_vm1 = vcmask 64512   ;;  %v1356_v1 = vld [vmem:[#allocation2] sm:$0xff]  ;;  %v249_v20 = vlaneseq }
  0x4a   :  { %1069 = vmatprep.subr.mxu0 %v1251_v0  ;;  %1071 = vmatprep.mubr.msk.f32.mxu0 %vm1252_vm0, %v1251_v0  ;;  %v163_v11 = vld [vmem:[#allocation5] sm:$0xff]  ;;  %s1253_s3 = smov 124   ;;  %v1254_v18 = vmov 1983009808   ;;  %v1255_v23 = vmov 1934713408  }
  0x4b   :  { %1074 = vmatprep.subr.mxu1 %v1251_v0  ;;  %1076 = vmatprep.mubr.msk.f32.mxu1 %vm1252_vm0, %v1251_v0  ;;  %v247_v19 = vunpack.c.l.s4 %v1254_v18  ;;  %v1367_v22 = vshrl.u32 %v249_v20, 7  ;;  %v278_v24 = vunpack.c.l.s4 %v1255_v23  ;;  %s1256_s1 = smov 4   ;;  %s1257_s15 = smov 12   ;;  %v647_v47 = vld [vmem:[#allocation8] sm:$0xff]  ;;  %v648_v48 = vld [vmem:[#allocation8 + $0x8] sm:$0xff]  ;;  %v649_v51 = vld [vmem:[#allocation8 + $0x10] sm:$0xff] }
  0x4c   :  { %1070 = vmatpush3.xpose.msk.msra.mxu0 %vm74_vm1, %v1356_v1  ;;  %1075 = vmatpush3.msra.mxu1 %v163_v11  ;;  %s1258_s16 = smov 16   ;;  %s1259_s17 = smov 20   ;;  %v1095_v49 = vpack.c.bf16 %v648_v48, %v647_v47  ;;  %v773_v50 = vld [vmem:[%s1668_s4] sm:$0xff]  ;;  %v650_v52 = vld [vmem:[#allocation8 + $0x18] sm:$0xff]  ;;  %vm487_vm2 = vcmask 31744   ;;  %vm504_vm3 = vcmask 97280  }
  0x4d   :  { %1090 = vmatprep.subr.mxu0 %v1251_v0  ;;  %v248_v21 = vunpack.c.0.s8 %v247_v19  ;;  %v279_v26 = vunpack.c.0.s8 %v278_v24  ;;  %s1260_s18 = smov 24   ;;  %s1261_s19 = smov 28   ;;  %v1099_v53 = vpack.c.bf16 %v650_v52, %v649_v51  ;;  %v1527_v18 = vld [vmem:[#allocation7] sm:$0xff]  ;;  %vm513_vm4 = vcmask 130048  }
  0x4e   :  { %1096 = vmatprep.subr.bf16.mxu1 %v1095_v49  ;;  %vm522_vm5 = vcmask 162816   ;;  %vm531_vm6 = vcmask 195584   ;;  %vm540_vm7 = vcmask 228352   ;;  %vm693_vm8 = vcmask 261120   ;;  %s1263_s4 = smov [#allocation10]  }
  0x4f   :  { %1072 = vmatmul.mubr.msk.f32.vlgmr.msra.gmra.mrb[0].mxu0 %vm74_vm1, %v1356_v1  ;;  %v1370_v25 = vsub.s32 %v248_v21, %v1367_v22  ;;  %v282_v29 = vsub.s32 %v279_v26, %v1367_v22  ;;  %s1037_s23 = sshll.u32 %s1263_s4, 4  ;;  %s1038_s23 = int_to_ptr.vmem [resolvable:$true] %s1037_s23 }
  0x50   :  { %1092 = vmatprep.mubr.msk.f32.mxu0 %vm1252_vm0, %v1251_v0  ;;  %1091 = vmatpush3.msra.mxu0 %v773_v50  ;;  %s1215_s24 = scalar_lea.vmem %s1038_s23, 256  ;;  %p1220_p5 = scmp.lt.s32.totalorder %s1038_s23, %s1038_s23 }
  0x51   :  { %p1216_p4 = scmp.ne.s32.totalorder %s1038_s23, %s1215_s24  ;;  %p1221_p6 = scmp.lt.s32.totalorder %s1215_s24, %s1215_s24 }
  0x53   :  { %1093 = vmatmul.mubr.msk.f32.vlgmr.msra.gmra.mrb[2].mxu0 %vm74_vm1, %v1356_v1  ;;  %p1222_p7 = por %p1221_p6, %p1220_p5 }
  0x55   :  { %p1223_p8 = pnand %p1222_p7, %p1216_p4 }
 0x122   :  { %v147_v2 = vpop.f32.mrb[0].mxu0 }
 0x123   :  { %v151_v3 = vmax.f32 %v147_v2, 0.0  ;;  %v1073_v4 = vpop.f32.mrb[1].mxu0 }
 0x125   :  { %v152_v5 = vsel %vm74_vm1, %v151_v3, -inf }
 0x126   :  { %153 = vmax.xlane.f32.xlu0 %v152_v5 }
 0x1b3   :  { %v154_v6 = vpop.xlane.xlu0 %153 }
 0x1b4   :  { %v155_v7 = vsub.f32 %v151_v3, %v154_v6 }
 0x1b6   :  { %v156_v8 = vmul.f32 1.442695, %v155_v7 }
 0x1b8   :  { %1123 = vpow2.f32 %v156_v8 }
 0x1c2   :  { %v1124_v9 = vpop.eup %1123 }
 0x1c3   :  { %v158_v10 = vsel %vm74_vm1, %v1124_v9, 0.0 }
 0x1c4   :  { %159 = vadd.xlane.f32.xlu0 %v158_v10  ;;  %v1262_v10 = vmov 1966171168  }
 0x251   :  { %v160_v12 = vpop.xlane.xlu0 %159 }
 0x252   :  { %1125 = vrcp.f32 %v160_v12 }
 0x25c   :  { %v1126_v13 = vpop.eup %1125 }
 0x25d   :  { %v162_v14 = vmul.f32 %v1126_v13, %v1124_v9 }
 0x25f   :  { %1077 = vmatmul.mubr.msk.f32.vlgmr.msra.gmra.mrb[0].mxu1 %vm74_vm1, %v162_v14 }
 0x260   :  { %1098 = vmatpush3.bf16.msra.mxu1 %v1095_v49 }
 0x261   :  { %1100 = vmatprep.subr.bf16.mxu1 %v1099_v53 }
 0x264   :  { %1102 = vmatpush3.bf16.msra.mxu1 %v1099_v53 }
 0x332   :  { %v235_v15 = vpop.f32.mrb[0].mxu1 }
 0x333   :  { %v236_v16 = vadd.f32 %v235_v15, %v163_v11  ;;  %v1078_v17 = vpop.f32.mrb[1].mxu1  ;;  %v552_v11 = vunpack.c.l.s4 %v1262_v10 }
 0x335   :  { %242 = vrot.lane.b32.xlu1 %v236_v16, %s1253_s3  ;;  %v252_v28 = vrot.slane %v236_v16, %v1370_v25  ;;  %v245_v35 = vcombine.high %v236_v16, %v1251_v0  ;;  %v553_v12 = vunpack.c.0.s8 %v552_v11 }
 0x337   :  { %v259_v38 = vrot.slane %v245_v35, %v1370_v25  ;;  %v1525_v15 = vsub.s32 %v553_v12, %v1367_v22 }
 0x339   :  { %v557_v19 = vrot.slane %v1527_v18, %v1525_v15 }
 0x33b   :  { %v565_v26 = vcombine.high %v557_v19, %v557_v19 }
 0x33d   :  { %v587_v35 = vrot.slane %v565_v26, %v1525_v15 }
 0x33f   :  { %v597_v50 = vcombine.high %v587_v35, %v587_v35 }
 0x3a7   :  { %v243_v27 = vpop.permute.xlu1 %242 }
 0x3a8   :  { %v267_v30 = vrot.slane %v243_v27, %v1370_v25  ;;  %v260_v32 = vcombine.high %v243_v27, %v1251_v0 }
 0x3aa   :  { %v275_v31 = vcombine.low %v252_v28, %v267_v30  ;;  %v276_v33 = vcombine.high %v252_v28, %v267_v30  ;;  %v274_v36 = vrot.slane %v260_v32, %v1370_v25  ;;  %v1541_v32 = vsub.s32 0, %v1367_v22 }
 0x3ac   :  { %v1376_v34 = vrot.slane %v275_v31, %v282_v29  ;;  %v1384_v37 = vrot.slane %v276_v33, %v282_v29  ;;  %v291_v39 = vcombine.low %v259_v38, %v274_v36  ;;  %v292_v41 = vcombine.high %v259_v38, %v274_v36 }
 0x3ad   :  { %v573_v31 = vrot.slane %v557_v19, %v1525_v15 }
 0x3ae   :  { %343 = vrot.lane.b32.xlu0 %v1376_v34, %s1250_s12  ;;  %319 = vrot.lane.b32.xlu1 %v1376_v34, %s1256_s1  ;;  %v1393_v40 = vcombine.high %v1384_v37, %v1251_v0  ;;  %v1399_v42 = vrot.slane %v291_v39, %v282_v29  ;;  %v1405_v43 = vrot.slane %v292_v41, %v282_v29 }
 0x3af   :  { %v1413_v44 = vcombine.high %v1376_v34, %v1251_v0  ;;  %v595_v38 = vcombine.high %v573_v31, %v573_v31  ;;  %v602_v22 = vrot.slane %v573_v31, %v1541_v32 }
 0x3b0   :  { %v1465_v45 = vcombine.high %v1399_v42, %v1251_v0  ;;  %v1473_v46 = vcombine.high %v1405_v43, %v1251_v0 }
 0x3b2   :  { %347 = vrot.lane.b32.xlu0 %v1384_v37, %s1250_s12  ;;  %323 = vrot.lane.b32.xlu1 %v1384_v37, %s1256_s1 }
 0x3b6   :  { %367 = vrot.lane.b32.xlu0 %v1376_v34, %s1257_s15  ;;  %325 = vrot.lane.b32.xlu1 %v1393_v40, %s1256_s1 }
 0x3ba   :  { %371 = vrot.lane.b32.xlu0 %v1384_v37, %s1257_s15  ;;  %327 = vrot.lane.b32.xlu1 %v1399_v42, %s1256_s1 }
 0x3be   :  { %391 = vrot.lane.b32.xlu0 %v1376_v34, %s1258_s16  ;;  %331 = vrot.lane.b32.xlu1 %v1405_v43, %s1256_s1 }
 0x3c2   :  { %395 = vrot.lane.b32.xlu0 %v1384_v37, %s1258_s16  ;;  %345 = vrot.lane.b32.xlu1 %v1413_v44, %s1250_s12 }
 0x3c6   :  { %415 = vrot.lane.b32.xlu0 %v1376_v34, %s1259_s17  ;;  %349 = vrot.lane.b32.xlu1 %v1393_v40, %s1250_s12 }
 0x3ca   :  { %419 = vrot.lane.b32.xlu0 %v1384_v37, %s1259_s17  ;;  %369 = vrot.lane.b32.xlu1 %v1413_v44, %s1257_s15 }
 0x3ce   :  { %439 = vrot.lane.b32.xlu0 %v1376_v34, %s1260_s18  ;;  %373 = vrot.lane.b32.xlu1 %v1393_v40, %s1257_s15 }
 0x3d2   :  { %443 = vrot.lane.b32.xlu0 %v1384_v37, %s1260_s18  ;;  %393 = vrot.lane.b32.xlu1 %v1413_v44, %s1258_s16 }
 0x3d6   :  { %463 = vrot.lane.b32.xlu0 %v1376_v34, %s1261_s19  ;;  %397 = vrot.lane.b32.xlu1 %v1393_v40, %s1258_s16 }
 0x3da   :  { %467 = vrot.lane.b32.xlu0 %v1384_v37, %s1261_s19  ;;  %417 = vrot.lane.b32.xlu1 %v1413_v44, %s1259_s17 }
 0x3de   :  { %321 = vrot.lane.b32.xlu0 %v1413_v44, %s1256_s1  ;;  %421 = vrot.lane.b32.xlu1 %v1393_v40, %s1259_s17 }
 0x3e2   :  { %351 = vrot.lane.b32.xlu0 %v1399_v42, %s1250_s12  ;;  %441 = vrot.lane.b32.xlu1 %v1413_v44, %s1260_s18 }
 0x3e6   :  { %355 = vrot.lane.b32.xlu0 %v1405_v43, %s1250_s12  ;;  %445 = vrot.lane.b32.xlu1 %v1393_v40, %s1260_s18 }
 0x3ea   :  { %375 = vrot.lane.b32.xlu0 %v1399_v42, %s1257_s15  ;;  %465 = vrot.lane.b32.xlu1 %v1413_v44, %s1261_s19 }
 0x3ee   :  { %379 = vrot.lane.b32.xlu0 %v1405_v43, %s1257_s15  ;;  %469 = vrot.lane.b32.xlu1 %v1393_v40, %s1261_s19 }
 0x3f2   :  { %399 = vrot.lane.b32.xlu0 %v1399_v42, %s1258_s16  ;;  %329 = vrot.lane.b32.xlu1 %v1465_v45, %s1256_s1 }
 0x3f6   :  { %403 = vrot.lane.b32.xlu0 %v1405_v43, %s1258_s16  ;;  %333 = vrot.lane.b32.xlu1 %v1473_v46, %s1256_s1 }
 0x3fa   :  { %423 = vrot.lane.b32.xlu0 %v1399_v42, %s1259_s17  ;;  %353 = vrot.lane.b32.xlu1 %v1465_v45, %s1250_s12 }
 0x3fe   :  { %427 = vrot.lane.b32.xlu0 %v1405_v43, %s1259_s17  ;;  %357 = vrot.lane.b32.xlu1 %v1473_v46, %s1250_s12 }
 0x402   :  { %447 = vrot.lane.b32.xlu0 %v1399_v42, %s1260_s18  ;;  %377 = vrot.lane.b32.xlu1 %v1465_v45, %s1257_s15 }
 0x406   :  { %451 = vrot.lane.b32.xlu0 %v1405_v43, %s1260_s18  ;;  %381 = vrot.lane.b32.xlu1 %v1473_v46, %s1257_s15 }
 0x40a   :  { %471 = vrot.lane.b32.xlu0 %v1399_v42, %s1261_s19  ;;  %401 = vrot.lane.b32.xlu1 %v1465_v45, %s1258_s16 }
 0x40e   :  { %475 = vrot.lane.b32.xlu0 %v1405_v43, %s1261_s19  ;;  %405 = vrot.lane.b32.xlu1 %v1473_v46, %s1258_s16 }
 0x412   :  { %425 = vrot.lane.b32.xlu1 %v1465_v45, %s1259_s17 }
 0x416   :  { %429 = vrot.lane.b32.xlu1 %v1473_v46, %s1259_s17 }
 0x41a   :  { %449 = vrot.lane.b32.xlu1 %v1465_v45, %s1260_s18 }
 0x41e   :  { %453 = vrot.lane.b32.xlu1 %v1473_v46, %s1260_s18 }
 0x420   :  { %v344_v54 = vpop.permute.xlu0 %343  ;;  %v320_v55 = vpop.permute.xlu1 %319 }
 0x421   :  { %v488_v30 = vsel %vm487_vm2, %v1376_v34, %v320_v55 }
 0x422   :  { %473 = vrot.lane.b32.xlu1 %v1465_v45, %s1261_s19  ;;  %v496_v39 = vsel %vm74_vm1, %v488_v30, %v344_v54  ;;  %v610_v54 = vrot.slane %v595_v38, %v1541_v32 }
 0x424   :  { %v348_v56 = vpop.permute.xlu0 %347  ;;  %v324_v57 = vpop.permute.xlu1 %323 }
 0x425   :  { %v490_v36 = vsel %vm487_vm2, %v1384_v37, %v324_v57  ;;  %v606_v37 = vrot.slane %v587_v35, %v1541_v32 }
 0x426   :  { %477 = vrot.lane.b32.xlu1 %v1473_v46, %s1261_s19  ;;  %v498_v48 = vsel %vm74_vm1, %v490_v36, %v348_v56 }
 0x428   :  { %v368_v58 = vpop.permute.xlu0 %367  ;;  %v326_v59 = vpop.permute.xlu1 %325 }
 0x429   :  { %v491_v51 = vsel %vm487_vm2, %v1393_v40, %v326_v59 }
 0x42c   :  { %v372_v60 = vpop.permute.xlu0 %371  ;;  %v1520_v61 = vpop.permute.xlu1 %327 }
 0x42d   :  { %v507_v52 = vsel %vm504_vm3, %v498_v48, %v372_v60 }
 0x430   :  { %v392_v62 = vpop.permute.xlu0 %391  ;;  %v1522_v63 = vpop.permute.xlu1 %331 }
 0x434   :  { %v396_v0 = vpop.permute.xlu0 %395  ;;  %v346_v1 = vpop.permute.xlu1 %345 }
 0x435   :  { %v516_v55 = vsel %vm513_vm4, %v507_v52, %v396_v0 }
 0x438   :  { %v416_v2 = vpop.permute.xlu0 %415  ;;  %v350_v3 = vpop.permute.xlu1 %349 }
 0x439   :  { %v499_v57 = vsel %vm74_vm1, %v491_v51, %v350_v3  ;;  %v614_v3 = vrot.slane %v597_v50, %v1541_v32 }
 0x43c   :  { %v420_v4 = vpop.permute.xlu0 %419  ;;  %v370_v5 = vpop.permute.xlu1 %369 }
 0x440   :  { %v440_v6 = vpop.permute.xlu0 %439  ;;  %v374_v7 = vpop.permute.xlu1 %373 }
 0x444   :  { %v444_v8 = vpop.permute.xlu0 %443  ;;  %v394_v9 = vpop.permute.xlu1 %393 }
 0x448   :  { %v464_v13 = vpop.permute.xlu0 %463  ;;  %v398_v14 = vpop.permute.xlu1 %397 }
 0x44c   :  { %v468_v16 = vpop.permute.xlu0 %467  ;;  %v418_v17 = vpop.permute.xlu1 %417 }
 0x450   :  { %v322_v20 = vpop.permute.xlu0 %321  ;;  %v422_v21 = vpop.permute.xlu1 %421 }
 0x451   :  { %v489_v23 = vsel %vm487_vm2, %v1413_v44, %v322_v20  ;;  %v505_v44 = vsel %vm504_vm3, %v496_v39, %v368_v58 }
 0x452   :  { %v497_v24 = vsel %vm74_vm1, %v489_v23, %v346_v1  ;;  %v514_v49 = vsel %vm513_vm4, %v505_v44, %v392_v62  ;;  %v525_v1 = vsel %vm522_vm5, %v516_v55, %v420_v4  ;;  %v550_v44 = vcombine.high %v1527_v18, %v1527_v18 }
 0x453   :  { %v506_v27 = vsel %vm504_vm3, %v497_v24, %v370_v5  ;;  %v523_v53 = vsel %vm522_vm5, %v514_v49, %v416_v2  ;;  %v508_v5 = vsel %vm504_vm3, %v499_v57, %v374_v7  ;;  %v534_v60 = vsel %vm531_vm6, %v525_v1, %v444_v8 }
 0x454   :  { %v1535_v28 = vpop.permute.xlu0 %351  ;;  %v442_v29 = vpop.permute.xlu1 %441  ;;  %v515_v33 = vsel %vm513_vm4, %v506_v27, %v394_v9  ;;  %v532_v56 = vsel %vm531_vm6, %v523_v53, %v440_v6  ;;  %v517_v2 = vsel %vm513_vm4, %v508_v5, %v398_v14  ;;  %v543_v6 = vsel %vm540_vm7, %v534_v60, %v468_v16 }
 0x455   :  { %v524_v47 = vsel %vm522_vm5, %v515_v33, %v418_v17  ;;  %v541_v40 = vsel %vm540_vm7, %v532_v56, %v464_v13  ;;  %v526_v10 = vsel %vm522_vm5, %v517_v2, %v422_v21  ;;  %v641_v13 = vmul.f32 %v610_v54, %v543_v6 }
 0x456   :  { %v533_v58 = vsel %vm531_vm6, %v524_v47, %v442_v29  ;;  %v639_v11 = vmul.f32 %v602_v22, %v541_v40  ;;  %v564_v47 = vrot.slane %v550_v44, %v1525_v15  ;;  %v492_v55 = vsel %vm487_vm2, %v1399_v42, %v1520_v61 }
 0x457   :  { %v500_v57 = vsel %vm74_vm1, %v492_v55, %v1535_v28  ;;  %v494_v5 = vsel %vm487_vm2, %v1405_v43, %v1522_v63 }
 0x458   :  { %v1548_v41 = vpop.permute.xlu0 %355  ;;  %v446_v34 = vpop.permute.xlu1 %445  ;;  %v580_v50 = vrot.slane %v564_v47, %v1525_v15 }
 0x459   :  { %v535_v4 = vsel %vm531_vm6, %v526_v10, %v446_v34  ;;  %v502_v61 = vsel %vm74_vm1, %v494_v5, %v1548_v41 }
 0x45a   :  { %v596_v51 = vcombine.high %v580_v50, %v580_v50 }
 0x45c   :  { %v466_v62 = vpop.permute.xlu1 %465  ;;  %v376_v0 = vpop.permute.xlu0 %375 }
 0x45d   :  { %v542_v59 = vsel %vm540_vm7, %v533_v58, %v466_v62  ;;  %v618_v58 = vrot.slane %v580_v50, %v1541_v32  ;;  %v626_v62 = vrot.slane %v596_v51, %v1541_v32  ;;  %v509_v40 = vsel %vm504_vm3, %v500_v57, %v376_v0 }
 0x45e   :  { %v640_v9 = vmul.f32 %v606_v37, %v542_v59  ;;  %v566_v37 = vcombine.high %v564_v47, %v564_v47 }
 0x460   :  { %v470_v7 = vpop.permute.xlu1 %469  ;;  %v659_v17 = vcombine.low %v639_v11, %v640_v9  ;;  %v380_v8 = vpop.permute.xlu0 %379  ;;  %v594_v53 = vrot.slane %v566_v37, %v1525_v15 }
 0x461   :  { %v544_v12 = vsel %vm540_vm7, %v535_v4, %v470_v7  ;;  %v511_v2 = vsel %vm504_vm3, %v502_v61, %v380_v8 }
 0x462   :  { %v642_v19 = vmul.f32 %v614_v3, %v544_v12  ;;  %v667_v23 = vrot.slane %v659_v17, %v1370_v25  ;;  %v598_v60 = vcombine.high %v594_v53, %v594_v53 }
 0x464   :  { %v660_v20 = vcombine.low %v641_v13, %v642_v19  ;;  %v330_v14 = vpop.permute.xlu1 %329  ;;  %v400_v21 = vpop.permute.xlu0 %399  ;;  %v630_v8 = vrot.slane %v598_v60, %v1541_v32 }
 0x465   :  { %v493_v18 = vsel %vm487_vm2, %v1465_v45, %v330_v14  ;;  %v622_v45 = vrot.slane %v594_v53, %v1541_v32  ;;  %v518_v28 = vsel %vm513_vm4, %v509_v40, %v400_v21 }
 0x466   :  { %v674_v24 = vrot.slane %v660_v20, %v1370_v25 }
 0x468   :  { %v334_v16 = vpop.permute.xlu1 %333  ;;  %v675_v26 = vcombine.low %v667_v23, %v674_v24  ;;  %v404_v29 = vpop.permute.xlu0 %403 }
 0x469   :  { %v495_v9 = vsel %vm487_vm2, %v1473_v46, %v334_v16  ;;  %v520_v0 = vsel %vm513_vm4, %v511_v2, %v404_v29 }
 0x46a   :  { %1087 = vmatprep.mubr.msk.f32.mxu1 %vm693_vm8, %v675_v26 }
 0x46c   :  { %v354_v27 = vpop.permute.xlu1 %353  ;;  %v424_v33 = vpop.permute.xlu0 %423 }
 0x46d   :  { %v501_v56 = vsel %vm74_vm1, %v493_v18, %v354_v27  ;;  %v527_v43 = vsel %vm522_vm5, %v518_v28, %v424_v33 }
 0x470   :  { %v358_v30 = vpop.permute.xlu1 %357  ;;  %v428_v36 = vpop.permute.xlu0 %427 }
 0x471   :  { %v503_v3 = vsel %vm74_vm1, %v495_v9, %v358_v30  ;;  %v529_v4 = vsel %vm522_vm5, %v520_v0, %v428_v36  ;;  %v840_v36 = vpop.f32.mrb[2].mxu0 }
 0x472   :  { %v896_v44 = vrot.slane %v840_v36, %v1525_v15 }
 0x474   :  { %v378_v31 = vpop.permute.xlu1 %377  ;;  %v448_v34 = vpop.permute.xlu0 %447  ;;  %v912_v37 = vrot.slane %v896_v44, %v1525_v15 }
 0x475   :  { %v510_v42 = vsel %vm504_vm3, %v501_v56, %v378_v31  ;;  %v536_v41 = vsel %vm531_vm6, %v527_v43, %v448_v34 }
 0x476   :  { %v941_v18 = vrot.slane %v912_v37, %v1541_v32 }
 0x478   :  { %v382_v35 = vpop.permute.xlu1 %381  ;;  %v452_v48 = vpop.permute.xlu0 %451 }
 0x479   :  { %v512_v7 = vsel %vm504_vm3, %v503_v3, %v382_v35  ;;  %v538_v13 = vsel %vm531_vm6, %v529_v4, %v452_v48  ;;  %v904_v48 = vcombine.high %v896_v44, %v896_v44 }
 0x47b   :  { %v926_v51 = vrot.slane %v904_v48, %v1525_v15 }
 0x47c   :  { %v402_v38 = vpop.permute.xlu1 %401  ;;  %v472_v54 = vpop.permute.xlu0 %471 }
 0x47d   :  { %v519_v59 = vsel %vm513_vm4, %v510_v42, %v402_v38  ;;  %v545_v46 = vsel %vm540_vm7, %v536_v41, %v472_v54  ;;  %v1094_v38 = vpop.f32.mrb[3].mxu0  ;;  %v934_v54 = vcombine.high %v912_v37, %v912_v37  ;;  %v936_v5 = vcombine.high %v926_v51, %v926_v51 }
 0x47e   :  { %v643_v23 = vmul.f32 %v618_v58, %v545_v46 }
 0x47f   :  { %v949_v9 = vrot.slane %v934_v54, %v1541_v32 }
 0x480   :  { %v406_v39 = vpop.permute.xlu1 %405  ;;  %v476_v6 = vpop.permute.xlu0 %475 }
 0x481   :  { %v521_v17 = vsel %vm513_vm4, %v512_v7, %v406_v39  ;;  %v547_v20 = vsel %vm540_vm7, %v538_v13, %v476_v6  ;;  %v889_v39 = vcombine.high %v840_v36, %v840_v36  ;;  %v953_v6 = vrot.slane %v936_v5, %v1541_v32 }
 0x482   :  { %v645_v21 = vmul.f32 %v626_v62, %v547_v20 }
 0x483   :  { %v903_v34 = vrot.slane %v889_v39, %v1525_v15 }
 0x484   :  { %v426_v22 = vpop.permute.xlu1 %425 }
 0x485   :  { %v528_v63 = vsel %vm522_vm5, %v519_v59, %v426_v22  ;;  %v905_v22 = vcombine.high %v903_v34, %v903_v34  ;;  %v919_v47 = vrot.slane %v903_v34, %v1525_v15 }
 0x487   :  { %v935_v50 = vcombine.high %v919_v47, %v919_v47  ;;  %v957_v53 = vrot.slane %v919_v47, %v1541_v32 }
 0x488   :  { %v430_v49 = vpop.permute.xlu1 %429 }
 0x489   :  { %v530_v14 = vsel %vm522_vm5, %v521_v17, %v430_v49  ;;  %v933_v49 = vrot.slane %v905_v22, %v1525_v15  ;;  %v965_v62 = vrot.slane %v935_v50, %v1541_v32  ;;  %v945_v15 = vrot.slane %v926_v51, %v1541_v32 }
 0x48b   :  { %v961_v58 = vrot.slane %v933_v49, %v1541_v32 }
 0x48c   :  { %v450_v52 = vpop.permute.xlu1 %449 }
 0x48d   :  { %v537_v10 = vsel %vm531_vm6, %v528_v63, %v450_v52  ;;  %v937_v52 = vcombine.high %v933_v49, %v933_v49 }
 0x48f   :  { %v969_v28 = vrot.slane %v937_v52, %v1541_v32 }
 0x490   :  { %v454_v1 = vpop.permute.xlu1 %453 }
 0x491   :  { %v539_v24 = vsel %vm531_vm6, %v530_v14, %v454_v1 }
 0x494   :  { %v474_v11 = vpop.permute.xlu1 %473 }
 0x495   :  { %v546_v12 = vsel %vm540_vm7, %v537_v10, %v474_v11 }
 0x496   :  { %v644_v19 = vmul.f32 %v622_v45, %v546_v12 }
 0x498   :  { %v478_v16 = vpop.permute.xlu1 %477  ;;  %v676_v27 = vcombine.low %v643_v23, %v644_v19 }
 0x499   :  { %v548_v26 = vsel %vm540_vm7, %v539_v24, %v478_v16 }
 0x49a   :  { %v646_v29 = vmul.f32 %v630_v8, %v548_v26  ;;  %v684_v31 = vrot.slane %v676_v27, %v1370_v25 }
 0x49c   :  { %v677_v30 = vcombine.low %v645_v21, %v646_v29 }
 0x49e   :  { %v691_v33 = vrot.slane %v677_v30, %v1370_v25 }
 0x4a0   :  { %v692_v35 = vcombine.low %v684_v31, %v691_v33 }
 0x4a2   :  { %1088 = vmatmul.mubr.msk.f32.vlgmr.msra.gmra.mrb[2].mxu1 %vm693_vm8, %v692_v35 }
 0x575   :  { %v1089_v55 = vpop.f32.mrb[2].mxu1 }
 0x576   :  { %v863_v57 = vcombine.high %v1089_v55, %v1089_v55  ;;  %v870_v56 = vrot.slane %v1089_v55, %v1370_v25  ;;  %v764_v1 = vpop.f32.mrb[3].mxu1 }
 0x577   :  { %v846_v40 = vcombine.high %v764_v1, %v764_v1  ;;  %v853_v42 = vrot.slane %v764_v1, %v1370_v25 }
 0x578   :  { %v877_v45 = vrot.slane %v863_v57, %v1370_v25  ;;  %v878_v61 = vcombine.high %v870_v56, %v870_v56  ;;  %v982_v59 = vadd.f32 %v957_v53, %v870_v56 }
 0x579   :  { %v860_v60 = vrot.slane %v846_v40, %v1370_v25  ;;  %v861_v2 = vcombine.high %v853_v42, %v853_v42  ;;  %v978_v43 = vadd.f32 %v941_v18, %v853_v42 }
 0x57a   :  { %v879_v63 = vcombine.high %v877_v45, %v877_v45  ;;  %v983_v0 = vadd.f32 %v961_v58, %v878_v61  ;;  %v984_v3 = vadd.f32 %v965_v62, %v877_v45 }
 0x57b   :  { %v862_v41 = vcombine.high %v860_v60, %v860_v60  ;;  %v979_v10 = vadd.f32 %v945_v15, %v861_v2  ;;  %v980_v11 = vadd.f32 %v949_v9, %v860_v60 }
 0x57c   :  { %v985_v4 = vadd.f32 %v969_v28, %v879_v63  ;;  %v1011_v7 = vcombine.low %v982_v59, %v983_v0 }
 0x57d   :  { %v981_v46 = vadd.f32 %v953_v6, %v862_v41  ;;  %v994_v12 = vcombine.low %v978_v43, %v979_v10 }
 0x57e   :  { %v1012_v13 = vcombine.low %v984_v3, %v985_v4  ;;  %v1019_v19 = vrot.slane %v1011_v7, %v1370_v25 }
 0x57f   :  { %v995_v17 = vcombine.low %v980_v11, %v981_v46  ;;  %v1002_v20 = vrot.slane %v994_v12, %v1370_v25 }
 0x580   :  { %v1026_v8 = vrot.slane %v1012_v13, %v1370_v25 }
 0x581   :  { %v1009_v14 = vrot.slane %v995_v17, %v1370_v25 }
 0x582   :  { %v1027_v23 = vcombine.low %v1019_v19, %v1026_v8 }
 0x583   :  { %v1010_v32 = vcombine.low %v1002_v20, %v1009_v14 }
 0x584   :  { %1031 = vst [vmem:[#allocation10 + $0x8] sm:$0xff] %v1027_v23 }
 0x585   :  { %1030 = vst [vmem:[#allocation10] sm:$0xff] %v1010_v32 }
 0x586   :  { %1226 = shalt.err (!%p1223_p8)
}
 0x587   :  { %s1227_s27 = scalar_lea.hbm %s1669_s5, 256 }
 0x588   :  { %p1228_p9 = scmp.ne.s32.totalorder %s1669_s5, %s1227_s27  ;;  %p1231_p10 = scmp.lt.u32.totalorder %s1227_s27, %s1669_s5 }
 0x58a   :  { %p1233_p11 = pnand %p1231_p10, %p1228_p9 }
 0x58c   :  { %1236 = shalt.err (!%p1233_p11)
}
 0x58d   :  { %1043 = dma.vmem_to_hbm [thread:$0]  %s1038_s23, 256, %s1669_s5, [#allocation4], %s1249_s2, %s1249_s2, %s1250_s12  }
 0x58e   :  { %1243 = dma.done.wait [#allocation4], 256  }
 0x58f   :  { %1244 = vsyncadd [#allocation4], 4294967040 }
 0x590   :  { %1047 = vsyncpa [#allocation3], 1 }
 0x591   :  { %1048 = vsyncpa [#allocation6], 1 }
 0x592   :  { %1049 = vsyncpa [#allocation9], 1 }
 0x593   :  { %1050 = vsyncpa [#allocation4], 1 }

</bundles_post_ra>
